<compile_context>
chip_gen: v7x
topology: tpu7x:2x2x1
jax: 0.10.0
libtpu: 0.0.40
codegen_flags: <defaults>
</compile_context>

<pallas_src>
import functools

import jax
import jax.numpy as jnp
from jax import lax
from jax.experimental import pallas as pl
from jax.experimental.pallas import tpu as pltpu

_LANE = 128  # keep the last dim lane-dense -> unmasked vector stores


def _round_up(a, b):
    return ((a + b - 1) // b) * b


def _to_i32(v):
    """Python int -> two's-complement int32 value (for hash constants)."""
    v &= 0xFFFFFFFF
    return v - (1 << 32) if v >= (1 << 31) else v


_C_SEED = _to_i32(0x9E3779B9)   # golden-ratio constant
_C_MIX1 = _to_i32(0x7FEB352D)
_C_MIX2 = _to_i32(0x846CA68B)
_SHR = lax.shift_right_logical  # logical shift on int32 bit patterns


def _dropout_kernel(seed_ref, x_ref, o_ref, *, keep_prob, scale, block_rows, lane):
    # Global element index of every position in this block (grid-invariant:
    # the realized mask does not depend on the tile size).
    row0 = pl.program_id(0) * block_rows
    r = lax.broadcasted_iota(jnp.int32, (block_rows, lane), 0)
    c = lax.broadcasted_iota(jnp.int32, (block_rows, lane), 1)
    idx = (row0 + r) * lane + c

    # Counter-based PRNG: murmur3-style finalizer of (index, seed). int32
    # arithmetic wraps; shifts are logical, so all values stay well-defined.
    h = idx + seed_ref[0] * _C_SEED
    h = h ^ _SHR(h, jnp.int32(16))
    h = h * _C_MIX1
    h = h ^ _SHR(h, jnp.int32(15))
    h = h * _C_MIX2
    h = h ^ _SHR(h, jnp.int32(16))

    # Uniform in [0, 1) from the top 24 bits (non-negative -> exact f32 cast);
    # avoids any signed/unsigned comparison ambiguity across generations.
    u = _SHR(h, jnp.int32(8)).astype(jnp.float32) * jnp.float32(1.0 / (1 << 24))
    keep = u < jnp.float32(keep_prob)

    x = x_ref[...]
    scaled = x * jnp.asarray(scale, x.dtype)
    o_ref[...] = jnp.where(keep, scaled, jnp.zeros_like(scaled))


def meta_dropout(x, p=0.5, *, seed=0, training=True,
                 max_rows_per_tile=4096, donate=False):
    """Forward of MetaDropout / nn.Dropout(p)."""
    if (not training) or p == 0.0:
        return x
    assert 0.0 < p < 1.0, "p must be in [0, 1)"

    keep_prob = 1.0 - float(p)
    scale = 1.0 / keep_prob

    orig_shape = x.shape
    n = x.size
    if n == 0:
        return x

    # Lane-dense (rows, 128) view of the flat tensor; pad only when needed.
    pad = (-n) % _LANE
    x_flat = x.reshape(-1)
    if pad:
        x_flat = jnp.pad(x_flat, (0, pad))
    rows = (n + pad) // _LANE
    x2d = x_flat.reshape(rows, _LANE)

    # Row-tile: large blocks (~2 MiB f32) to amortize per-step overhead, but
    # keep >= 2 grid steps (when possible) so v7x can use both TensorCores.
    if rows <= 8:
        tm = rows                              # block == full array dims
    else:
        tm = min(max_rows_per_tile, _round_up(rows, 8))
        if pl.cdiv(rows, tm) < 2:
            tm = max(8, _round_up(pl.cdiv(rows, 2), 8))
    grid = (pl.cdiv(rows, tm),)                # last block may be partial

    seed_arr = jnp.asarray([seed], dtype=jnp.int32)
    kernel = functools.partial(
        _dropout_kernel, keep_prob=keep_prob, scale=scale,
        block_rows=tm, lane=_LANE)

    aliases = {1: 0} if (donate and pad == 0) else {}

    out2d = pl.pallas_call(
        kernel,
        out_shape=jax.ShapeDtypeStruct((rows, _LANE), x.dtype),
        grid_spec=pltpu.PrefetchScalarGridSpec(
            num_scalar_prefetch=1,             # seed lives in SMEM
            grid=grid,
            in_specs=[pl.BlockSpec((tm, _LANE), lambda i, seed_ref: (i, 0))],
            out_specs=pl.BlockSpec((tm, _LANE), lambda i, seed_ref: (i, 0)),
        ),
        compiler_params=pltpu.CompilerParams(
            dimension_semantics=("parallel",),  # independent tiles
            vmem_limit_bytes=32 * 1024 * 1024),
        input_output_aliases=aliases,
    )(seed_arr, x2d)

    out_flat = out2d.reshape(-1)
    if pad:
        out_flat = out_flat[:n]
    return out_flat.reshape(orig_shape)


if __name__ == "__main__":
    key = jax.random.PRNGKey(0)
    x = jax.random.normal(key, (2, 4, 16, 16), jnp.float32)
    p = 0.5
    scale = 1.0 / (1.0 - p)

    out = jax.block_until_ready(meta_dropout(x, p=p, seed=0, training=True))
    assert out.shape == x.shape

    # Every element is either exactly zero (dropped) or x / (1 - p) (kept).
    dropped = out == 0.0
    kept_ok = jnp.isclose(out, x * scale, atol=1e-6, rtol=1e-6)
    assert bool(jnp.all(dropped | kept_ok))

    # Keep rate near 1 - p (2048 samples, loose bound).
    keep_rate = float(jnp.mean(~dropped))
    assert 0.3 < keep_rate < 0.7, keep_rate

    # Small-p sanity check (guards against a broken threshold/compare path).
    out_lo = jax.block_until_ready(meta_dropout(x, p=0.1, seed=3, training=True))
    keep_rate_lo = float(jnp.mean(out_lo != 0.0))
    assert 0.84 < keep_rate_lo < 0.96, keep_rate_lo

    # Eval mode is identity.
    out_eval = jax.block_until_ready(meta_dropout(x, p=p, training=False))
    assert bool(jnp.all(out_eval == x))

    # Ragged size (not a multiple of 128): exercises the pad + tail path.
    xr = jax.random.normal(jax.random.PRNGKey(1), (3, 5, 7), jnp.float32)
    outr = jax.block_until_ready(meta_dropout(xr, p=p, seed=7, training=True))
    assert outr.shape == xr.shape
    ok_r = (outr == 0.0) | jnp.isclose(outr, xr * scale, atol=1e-6, rtol=1e-6)
    assert bool(jnp.all(ok_r))

    # Partial last grid block (rows not a multiple of tm).
    xp = jax.random.normal(jax.random.PRNGKey(2), (2, 660, 128), jnp.float32)
    outp = jax.block_until_ready(meta_dropout(xp, p=p, seed=11, training=True))
    assert outp.shape == xp.shape
    ok_p = (outp == 0.0) | jnp.isclose(outp, xp * scale, atol=1e-6, rtol=1e-6)
    assert bool(jnp.all(ok_p))

    print("KERNEL_OK")
</pallas_src>

<mosaic_0001>
module attributes {stable_mosaic.version = 11 : i64} {
  func.func @_dropout_kernel(%arg0: i32, %arg1: memref<1xi32, #tpu.memory_space<smem>>, %arg2: memref<8x128xf32, #tpu.memory_space<vmem>>, %arg3: memref<8x128xf32, #tpu.memory_space<vmem>>) attributes {dimension_semantics = [#tpu.dimension_semantics<parallel>], iteration_bounds = array<i64: 2>, scalar_prefetch = 1 : i64, scratch_operands = 0 : i64, tpu.core_type = #tpu.core_type<tc>, window_params = [{transform_indices = @transform_0, window_bounds = array<i64: 8, 128>}, {transform_indices = @transform_1, window_bounds = array<i64: 8, 128>}]} {
    %c8_i32 = arith.constant 8 : i32
    %0 = arith.muli %arg0, %c8_i32 : i32
    %1 = tpu.iota {dimensions = array<i32: 0>} : vector<8x128xi32>
    %2 = tpu.iota {dimensions = array<i32: 1>} : vector<8x128xi32>
    %3 = vector.broadcast %0 : i32 to vector<8x128xi32>
    %4 = arith.addi %3, %1 : vector<8x128xi32>
    %c128_i32 = arith.constant 128 : i32
    %5 = vector.broadcast %c128_i32 : i32 to vector<8x128xi32>
    %6 = arith.muli %4, %5 : vector<8x128xi32>
    %7 = arith.addi %6, %2 : vector<8x128xi32>
    %c0 = arith.constant 0 : index
    %8 = memref.load %arg1[%c0] : memref<1xi32, #tpu.memory_space<smem>>
    %c-1640531527_i32 = arith.constant -1640531527 : i32
    %9 = arith.muli %8, %c-1640531527_i32 : i32
    %10 = vector.broadcast %9 : i32 to vector<8x128xi32>
    %11 = arith.addi %7, %10 : vector<8x128xi32>
    %c16_i32 = arith.constant 16 : i32
    %12 = vector.broadcast %c16_i32 : i32 to vector<8x128xi32>
    %13 = arith.shrui %11, %12 : vector<8x128xi32>
    %14 = arith.xori %11, %13 : vector<8x128xi32>
    %c2146121005_i32 = arith.constant 2146121005 : i32
    %15 = vector.broadcast %c2146121005_i32 : i32 to vector<8x128xi32>
    %16 = arith.muli %14, %15 : vector<8x128xi32>
    %c15_i32 = arith.constant 15 : i32
    %17 = vector.broadcast %c15_i32 : i32 to vector<8x128xi32>
    %18 = arith.shrui %16, %17 : vector<8x128xi32>
    %19 = arith.xori %16, %18 : vector<8x128xi32>
    %c-2073254261_i32 = arith.constant -2073254261 : i32
    %20 = vector.broadcast %c-2073254261_i32 : i32 to vector<8x128xi32>
    %21 = arith.muli %19, %20 : vector<8x128xi32>
    %c16_i32_0 = arith.constant 16 : i32
    %22 = vector.broadcast %c16_i32_0 : i32 to vector<8x128xi32>
    %23 = arith.shrui %21, %22 : vector<8x128xi32>
    %24 = arith.xori %21, %23 : vector<8x128xi32>
    %c8_i32_1 = arith.constant 8 : i32
    %25 = vector.broadcast %c8_i32_1 : i32 to vector<8x128xi32>
    %26 = arith.shrui %24, %25 : vector<8x128xi32>
    %27 = arith.sitofp %26 : vector<8x128xi32> to vector<8x128xf32>
    %cst = arith.constant 5.96046448E-8 : f32
    %28 = vector.broadcast %cst : f32 to vector<8x128xf32>
    %29 = arith.mulf %27, %28 : vector<8x128xf32>
    %cst_2 = arith.constant 5.000000e-01 : f32
    %30 = vector.broadcast %cst_2 : f32 to vector<8x128xf32>
    %31 = arith.cmpf olt, %29, %30 : vector<8x128xf32>
    %c0_3 = arith.constant 0 : index
    %c0_4 = arith.constant 0 : index
    %32 = vector.load %arg2[%c0_3, %c0_4] : memref<8x128xf32, #tpu.memory_space<vmem>>, vector<8x128xf32>
    %cst_5 = arith.constant 2.000000e+00 : f32
    %33 = vector.broadcast %cst_5 : f32 to vector<8x128xf32>
    %34 = arith.mulf %32, %33 : vector<8x128xf32>
    %cst_6 = arith.constant 0.000000e+00 : f32
    %35 = vector.broadcast %cst_6 : f32 to vector<8x128xf32>
    %36 = arith.select %31, %34, %35 : vector<8x128xi1>, vector<8x128xf32>
    %c0_7 = arith.constant 0 : index
    %c0_8 = arith.constant 0 : index
    %37 = vector.load %arg3[%c0_7, %c0_8] : memref<8x128xf32, #tpu.memory_space<vmem>>, vector<8x128xf32>
    tpu.vector_store %arg3[%c0_7, %c0_8], %36 {strides = array<i32>} : memref<8x128xf32, #tpu.memory_space<vmem>>, vector<8x128xf32>,
    return
  }
  func.func @transform_0(%arg0: i32, %arg1: memref<1xi32, #tpu.memory_space<smem>>) -> (i32, i32) {
    %c0_i32 = arith.constant 0 : i32
    %c0_i32_0 = arith.constant 0 : i32
    return %arg0, %c0_i32 : i32, i32
  }
  func.func @transform_1(%arg0: i32, %arg1: memref<1xi32, #tpu.memory_space<smem>>) -> (i32, i32) {
    %c0_i32 = arith.constant 0 : i32
    %c0_i32_0 = arith.constant 0 : i32
    return %arg0, %c0_i32 : i32, i32
  }
}

</mosaic_0001>

<bundles_post_ra>
// kernel: tpu_custom_call.1
= control target key start
LH: loop header
LB: loop body
LE: loop exit
PB: predicated region body
PF: predicated region fallthrough
CT: control target
= control target key end

     0   :  { %s586_s0 = inlined_call_operand.<no memory space> [shape: s32[1], index: 0, kind: input, shape index: {}]   ;;  %s587_s1 = inlined_call_operand.hbm [shape: f32[16,128], index: 1, kind: input, shape index: {}]   ;;  %s588_s2 = inlined_call_operand.hbm [shape: f32[16,128], index: 2, kind: output, shape index: {}]  }
   0x1   :  { %7 = sst [smem:[#allocation3]] %s586_s0 }
   0x2   :  { %8 = vsyncpa [#allocation5], 0 }
   0x3   :  { %10 = vsyncpa [#allocation5 + $0x1], 0 }
   0x4   :  { %11 = vsyncpa [#allocation6], 0 }
   0x5   :  { %13 = vsyncpa [#allocation6 + $0x1], 0  ;;  %s424_s11 = smov 0   ;;  %s426_s12 = smov 0  }
   0x6   :  { %s428_s13 = smov 0   ;;  %s430_s14 = smov 0  }
   0x7 LB: > { %s445_s0 = sadd.s32 4294967295, %s402_s14   ;;  %s247_s15 = sadd.s32 4294967294, %s402_s14   ;;  %s402_s14 = sphi %s430_s14, %s603_s14   ;;  %s398_s13 = sphi %s428_s13, %s602_s13   ;;  %s394_s12 = sphi %s426_s12, %s601_s12   ;;  %s390_s11 = sphi %s424_s11, %s600_s11  }
   0x8   : > { %s449_s16 = sadd.s32 1, %s402_s14   ;;  %s26_s17 = sadd.s32 1, %s398_s13 }
   0x9   : > { %s23_s18 = ssub.s32 %s402_s14, %s449_s16  ;;  %p33_p0 = scmp.ne.s32.totalorder %s398_s13, %s394_s12 }
   0xa   : > { %p24_p1 = scmp.eq.s32.totalorder %s23_s18, 0  ;;  %p34_p2 = scmp.eq.s32.totalorder %s402_s14, 0 }
   0xb   : > { %p39_p3 = scmp.ne.s32.totalorder %s394_s12, %s390_s11  ;;  %p40_p4 = scmp.eq.s32.totalorder %s445_s0, 0 }
   0xc   : > { %s461_s19 = scalar_select %p24_p1, %s398_s13, %s26_s17  }
   0xd   : > { %p463_p5 = por %p34_p2, %p33_p0  ;;  %p467_p6 = por %p40_p4, %p39_p3 }
   0xe   : > { %p63_p7 = scmp.eq.s32.totalorder %s445_s0, 1  ;;  %p69_p8 = scmp.eq.s32.totalorder %s247_s15, 1 }
   0xf   : > { %p272_p10 = scmp.lt.s32.totalorder %s402_s14, 2  ;;  %s89_s24 = sand.u32 1, %s398_s13  }
  0x10   : > { %p474_p11 = por %p63_p7, %p33_p0  ;;  %p478_p12 = por %p69_p8, %p39_p3 }
  0x11   : > { %s251_s25 = sshll.u32 %s402_s14, 7  ;;  %s250_s26 = sshll.u32 %s89_s24, 3 }
  0x12   : > { %s592_s22 = scalar_select %p474_p11, 1, 0 }
  0x13   : > { %s593_s23 = scalar_select %p478_p12, 1, 0 }
  0x14   : > { %s487_s29 = scalar_lea.hbm %s587_s1, %s251_s25  ;;  %s93_s30 = scalar_lea.vmem [#allocation4], %s250_s26 }
  0x15   : > { %s100_s3 = sshll.u32 %s93_s30, 4  ;;  %p491_p13 = pnand %p272_p10, %p463_p5  ;;  %s495_s3 = int_to_ptr.vmem [resolvable:$true] %s100_s3 }
  0x16   : > { %s90_s5 = scalar_lea.sflag [#allocation5], %s89_s24  ;;  %s306_s6 = scalar_lea.hbm %s487_s29, 128 }
  0x17   : > { %p307_p2 = scmp.ne.s32.totalorder %s487_s29, %s306_s6  ;;  %p308_p3 = pneg %p491_p13 }
  0x18   : > { %s311_s9 = scalar_lea.hbm %s587_s1, 256  ;;  %p312_p5 = scmp.lt.u32.totalorder %s487_s29, %s587_s1 }
  0x19   : > { %p309_p4 = pnand %p308_p3, %p307_p2  ;;  %p313_p8 = scmp.lt.u32.totalorder %s311_s9, %s306_s6 }
  0x1a   : > { %p315_p9 = scmp.lt.u32.totalorder %s306_s6, %s487_s29 }
  0x1b   : > { %p310_p7 = pneg %p309_p4  ;;  %p314_p10 = por %p313_p8, %p312_p5 }
  0x1d   : > { %p316_p0 = por %p315_p9, %p314_p10 }
  0x1f   : > { %p317_p1 = pnand %p316_p0, %p310_p7 }
  0x21   : > { %320 = shalt.err (!%p317_p1)
}
  0x22   : > { %s321_s17 = scalar_lea.vmem %s495_s3, 128  ;;  %s404_s18 = smov [#allocation4]  }
  0x23   : > { %p322_p2 = scmp.ne.s32.totalorder %s495_s3, %s321_s17  ;;  %s326_s20 = sshll.u32 %s404_s18, 4  ;;  %s327_s20 = int_to_ptr.vmem [resolvable:$false] %s326_s20 }
  0x24   : > { %s328_s24 = scalar_lea.vmem %s327_s20, 256  ;;  %p329_p11 = scmp.lt.s32.totalorder %s495_s3, %s327_s20 }
  0x25   : > { %p324_p4 = pnand %p322_p2, %p308_p3  ;;  %p330_p5 = scmp.lt.s32.totalorder %s328_s24, %s321_s17 }
  0x27   : > { %p325_p12 = pneg %p324_p4  ;;  %p331_p8 = por %p330_p5, %p329_p11 }
  0x29   : > { %p332_p9 = pnand %p331_p8, %p325_p12 }
  0x2b   : > { %335 = shalt.err (!%p332_p9)
}
  0x2c   : > { %267 = dma.hbm_to_vmem [thread:$0]  (!%p491_p13), %s487_s29, 128, %s495_s3, %s90_s5  }
  0x2d   : > { %p595_p0 = scmp.lt.s32.totalorder %s402_s14, 3  ;;  %p596_p1 = scmp.ge.s32.totalorder %s402_s14, 1 }
  0x2f   : > { %p106_p3 = pnand %p596_p1, %p595_p0 }
  0x30   : > { %s529_s25 = sand.u32 (!%p106_p3), 1, %s394_s12  }
  0x31   : > { %109 = sbr.rel (%p106_p3) target bundleno = 107 (0x6b), region = 24  ;;  %s253_s26 = sshll.u32 (!%p106_p3), %s529_s25, 3 }
  0x32   : > { %s112_s27 = scalar_lea.sflag (!%p106_p3), [#allocation5], %s529_s25  ;;  %s115_s28 = scalar_lea.vmem (!%p106_p3), [#allocation4], %s253_s26 }
  0x38   : > { %381 = dma.done.wait (%p467_p6), %s112_s27, 128  }
  0x39   : > { %383 = vsyncadd (%p467_p6), %s112_s27, 4294967168  ;;  %s255_s29 = sshll.u32 %s445_s0, 3  ;;  %v135_v0 = vlaneseq  ;;  %s143_s30 = sld [smem:[#allocation3]]  ;;  %v159_v18 = vld [vmem:[%s115_s28] sm:$0xff] }
  0x3a   : > { %v139_v1 = vstv %s255_s29  ;;  %s133_s21 = scalar_lea.vmem [#allocation7], %s253_s26  ;;  %v160_v20 = vmul.f32 2.0, %v159_v18  ;;  %s257_s5 = sshll.u32 %s445_s0, 7 }
  0x3b   : > { %v136_v2 = vshrl.u32 %v135_v0, 7  ;;  %v138_v3 = vand.u32 127, %v135_v0  ;;  %s177_s4 = sshll.u32 %s133_s21, 4  ;;  %s544_s8 = scalar_lea.hbm %s588_s2, %s257_s5  ;;  %s539_s4 = int_to_ptr.vmem [resolvable:$true] %s177_s4 }
  0x3c   : > { %s164_s9 = scalar_lea.sflag [#allocation6], %s529_s25  ;;  %s336_s10 = scalar_lea.vmem %s539_s4, 128 }
  0x3d   : > { %v140_v4 = vadd.s32 %v139_v1, %v136_v2  ;;  %p337_p6 = scmp.ne.s32.totalorder %s539_s4, %s336_s10  ;;  %p597_p11 = scmp.ne.s32.totalorder %s592_s22, 0 }
  0x3e   : > { %s405_s0 = smov [#allocation7]  }
  0x3f   : > { %v141_v5 = vmul.u32 128, %v140_v4  ;;  %s144_s3 = smul.u32 2654435769, %s143_s30  ;;  %p338_p12 = pnand %p337_p6, %p597_p11 }
  0x40   : > { %s340_s15 = sshll.u32 %s405_s0, 4  ;;  %s341_s15 = int_to_ptr.vmem [resolvable:$false] %s340_s15 }
  0x41   : > { %v142_v6 = vadd.s32 %v141_v5, %v138_v3  ;;  %v145_v7 = vstv %s144_s3  ;;  %p339_p13 = pneg %p338_p12  ;;  %s342_s17 = scalar_lea.vmem %s341_s15, 256 }
  0x42   : > { %p343_p7 = scmp.lt.s32.totalorder %s539_s4, %s341_s15  ;;  %p344_p10 = scmp.lt.s32.totalorder %s342_s17, %s336_s10 }
  0x43   : > { %v146_v8 = vadd.s32 %v145_v7, %v142_v6 }
  0x44   : > { %p345_p2 = por %p344_p10, %p343_p7 }
  0x45   : > { %v147_v9 = vshrl.u32 %v146_v8, 16 }
  0x46   : > { %p346_p4 = pnand %p345_p2, %p339_p13 }
  0x47   : > { %v148_v10 = vxor.u32 %v147_v9, %v146_v8 }
  0x49   : > { %v149_v11 = vmul.u32 2146121005, %v148_v10 }
  0x4b   : > { %v150_v12 = vshrl.u32 %v149_v11, 15 }
  0x4d   : > { %v151_v13 = vxor.u32 %v150_v12, %v149_v11 }
  0x4f   : > { %v152_v14 = vmul.u32 2221713035, %v151_v13 }
  0x51   : > { %v153_v15 = vshrl.u32 %v152_v14, 16 }
  0x53   : > { %v154_v16 = vxor.u32 %v153_v15, %v152_v14 }
  0x55   : > { %v155_v17 = vshrl.u32 %v154_v16, 8 }
  0x57   : > { %v156_v19 = vcvt.s32.f32 %v155_v17 }
  0x59   : > { %v157_v21 = vmul.f32 5.9604645e-08, %v156_v19 }
  0x5b   : > { %vm158_vm0 = vcmp.lt.f32.partialorder %v157_v21, 0.5 }
  0x5c   : > { %v161_v22 = vsel %vm158_vm0, %v160_v20, 0.0 }
  0x5d   : > { %162 = vst [vmem:[%s133_s21] sm:$0xff] %v161_v22 }
  0x5e   : > { %349 = shalt.err (!%p346_p4)
}
  0x5f   : > { %s350_s18 = scalar_lea.hbm %s544_s8, 128  ;;  %s354_s25 = scalar_lea.hbm %s588_s2, 256 }
  0x60   : > { %p351_p5 = scmp.ne.s32.totalorder %s544_s8, %s350_s18  ;;  %p355_p0 = scmp.lt.u32.totalorder %s544_s8, %s588_s2 }
  0x61   : > { %p356_p1 = scmp.lt.u32.totalorder %s354_s25, %s350_s18  ;;  %p358_p6 = scmp.lt.u32.totalorder %s350_s18, %s544_s8 }
  0x62   : > { %p352_p8 = pnand %p351_p5, %p597_p11 }
  0x63   : > { %p357_p3 = por %p356_p1, %p355_p0 }
  0x64   : > { %p353_p9 = pneg %p352_p8 }
  0x65   : > { %p359_p12 = por %p358_p6, %p357_p3 }
  0x67   : > { %p360_p13 = pnand %p359_p12, %p353_p9 }
  0x69   : > { %363 = shalt.err (!%p360_p13)
}
  0x6a   : > { %262 = dma.vmem_to_hbm [thread:$0]  (%p597_p11), %s539_s4, 128, %s544_s8, %s164_s9  }
  0x6b PF: > { %s189_s28 = sand.u32 1, %s390_s11   ;;  %p598_p7 = scmp.ne.s32.totalorder %s593_s23, 0 }
  0x6c   : > { %p599_p10 = scmp.ge.s32.totalorder %s402_s14, 2  ;;  %s190_s29 = scalar_lea.sflag [#allocation6], %s189_s28 }
  0x6e   : > { %p269_p2 = pnand %p599_p10, %p598_p7 }
  0x70   : > { %385 = dma.done.wait (!%p269_p2), %s190_s29, 128  }
  0x71   : > { %387 = vsyncadd (!%p269_p2), %s190_s29, 4294967168  ;;  %p16_p4 = scmp.ge.s32.totalorder %s449_s16, 4   ;;  %s600_s11 = smov %s394_s12 }
  0x72   : > { %s601_s12 = smov %s398_s13  ;;  %s602_s13 = smov %s461_s19 }
  0x73   : > { %s603_s14 = smov %s449_s16  ;;  %18 = sbr.rel (!%p16_p4) target bundleno = 7 (0x7), region = 69 }
  0x7a   :  { %195 = vsyncpa [#allocation5], 1 }
  0x7b   :  { %197 = vsyncpa [#allocation5 + $0x1], 1 }
  0x7c   :  { %198 = vsyncpa [#allocation6], 1 }
  0x7d   :  { %200 = vsyncpa [#allocation6 + $0x1], 1 }

</bundles_post_ra>
